<compile_context>
chip_gen: v5e
topology: v5e:2x2
jax: 0.10.0
libtpu: 0.0.40
codegen_flags: <defaults>
</compile_context>

<pallas_src>
import functools

import jax
import jax.numpy as jnp
from jax.experimental import pallas as pl
from jax.experimental.pallas import tpu as pltpu


def _round_up(n, m):
    return ((n + m - 1) // m) * m


def laugh_classifier_kernel(x_ref, w1_ref, b1_ref, w2_ref, b2_ref, out_ref,
                            *, hidden_size):
    # fc1: (tb, I) @ (I, SLAB) -> (tb, SLAB).  Lanes [0:H] hold the real hidden
    # units; lanes [H:] are zero-padded weight columns -> relu(0 + 0) = 0.
    h = jax.lax.dot_general(
        x_ref[...], w1_ref[...],
        dimension_numbers=(((1,), (0,)), ((), ())),
        preferred_element_type=jnp.float32)
    h = jnp.maximum(h + b1_ref[...], 0.0)          # bias + ReLU, f32

    # (dropout with p = 0.0 is the identity.)

    # fc2 fused into the packed slab: w2_ref is (SLAB, SLAB) with W2^T placed
    # at rows [0:H], cols [H:H+O] (zero elsewhere), so the logits land directly
    # in lanes [H:H+O].  Zero-padded hidden lanes contribute exact zeros.
    y = jax.lax.dot_general(
        h, w2_ref[...],
        dimension_numbers=(((1,), (0,)), ((), ())),
        preferred_element_type=jnp.float32)
    y = jax.nn.sigmoid(y + b2_ref[...])            # bias + sigmoid (EUP), f32

    # Pack: lanes [0:H] = relu hidden (out2, exact), lanes [H:] = sigmoid head.
    lane = jax.lax.broadcasted_iota(jnp.int32, h.shape, 1)
    slab = jnp.where(lane < hidden_size, h, y)
    out_ref[...] = slab.astype(out_ref.dtype)      # single full-width lane store


def prepare_params(w1, b1, w2, b2):
    """One-time (init-time) transpose + pad of nn.Linear params.

    w1: (H, I), b1: (H,), w2: (O, H), b2: (O,)  -- PyTorch layout.

    Produces lane-dense, pre-transposed operands for a packed output slab of
    width SLAB = round_up(H + O, 128):
      w1t: (I, SLAB)    cols [0:H]            = W1^T
      b1p: (1, SLAB)    lanes [0:H]           = b1
      w2t: (SLAB, SLAB) rows [0:H], cols [H:H+O] = W2^T
      b2p: (1, SLAB)    lanes [H:H+O]         = b2
    """
    H, I = w1.shape
    O, _ = w2.shape
    SLAB = _round_up(H + O, 128)
    w1t = jnp.zeros((I, SLAB), w1.dtype).at[:, :H].set(w1.T)
    b1p = jnp.zeros((1, SLAB), b1.dtype).at[0, :H].set(b1)
    w2t = jnp.zeros((SLAB, SLAB), w2.dtype).at[:H, H:H + O].set(w2.T)
    b2p = jnp.zeros((1, SLAB), b2.dtype).at[0, H:H + O].set(b2)
    return (w1t, b1p, w2t, b2p), (H, O)


@functools.partial(jax.jit, static_argnums=(2, 3))
def laugh_classifier(x, padded_params, hidden_size, output_size):
    """x: (B, I).  padded_params from prepare_params().  Returns (out, out2)."""
    w1t, b1p, w2t, b2p = padded_params
    B, I = x.shape
    SLAB = w1t.shape[1]

    # Batch tile: large to amortize per-step overhead, but keep >= 2 grid steps
    # whenever B >= 16 so v7x's two TensorCores both get work.
    TB_MAX = 2048
    tb = min(TB_MAX, B)
    if B >= 16 and tb >= B:
        tb = _round_up(pl.cdiv(B, 2), 8)
    nb = pl.cdiv(B, tb)

    slab = pl.pallas_call(
        functools.partial(laugh_classifier_kernel, hidden_size=hidden_size),
        out_shape=jax.ShapeDtypeStruct((B, SLAB), x.dtype),
        grid=(nb,),
        in_specs=[
            pl.BlockSpec((tb, I), lambda i: (i, 0)),       # batch-tiled input
            pl.BlockSpec((I, SLAB), lambda i: (0, 0)),     # fc1 weight (pre-T)
            pl.BlockSpec((1, SLAB), lambda i: (0, 0)),     # fc1 bias
            pl.BlockSpec((SLAB, SLAB), lambda i: (0, 0)),  # fc2 weight (pre-T, packed cols)
            pl.BlockSpec((1, SLAB), lambda i: (0, 0)),     # fc2 bias (packed lanes)
        ],
        out_specs=pl.BlockSpec((tb, SLAB), lambda i: (i, 0)),
        compiler_params=pltpu.CompilerParams(
            dimension_semantics=("parallel",)),            # megacore-shardable batch
    )(x, w1t, b1p, w2t, b2p)

    # Cheap slices on the packed slab.
    out2 = slab[:, :hidden_size]
    out = slab[:, hidden_size:hidden_size + output_size]
    return out, out2


def reference(x, w1, b1, w2, b2):
    out2 = jnp.maximum(x @ w1.T + b1, 0.0)
    out = jax.nn.sigmoid(out2 @ w2.T + b2)
    return out, out2


if __name__ == "__main__":
    # Small shapes consistent with the module: batch=16, input=32, hidden=64, output=8
    B, I, H, O = 16, 32, 64, 8

    key = jax.random.PRNGKey(0)
    kx, k1, k2, k3, k4 = jax.random.split(key, 5)

    x = jax.random.normal(kx, (B, I), dtype=jnp.float32)
    # Deterministic parameter init (roughly matching nn.Linear's uniform scale)
    w1 = jax.random.uniform(k1, (H, I), minval=-1.0 / I**0.5, maxval=1.0 / I**0.5,
                            dtype=jnp.float32)
    b1 = jax.random.uniform(k2, (H,), minval=-1.0 / I**0.5, maxval=1.0 / I**0.5,
                            dtype=jnp.float32)
    w2 = jax.random.uniform(k3, (O, H), minval=-1.0 / H**0.5, maxval=1.0 / H**0.5,
                            dtype=jnp.float32)
    b2 = jax.random.uniform(k4, (O,), minval=-1.0 / H**0.5, maxval=1.0 / H**0.5,
                            dtype=jnp.float32)

    # One-time parameter preparation (init-time, not per call).
    padded_params, (hidden_size, output_size) = prepare_params(w1, b1, w2, b2)

    out, out2 = laugh_classifier(x, padded_params, hidden_size, output_size)
    jax.block_until_ready((out, out2))

    ref_out, ref_out2 = reference(x, w1, b1, w2, b2)
    assert out.shape == (B, O) and out2.shape == (B, H)
    assert jnp.allclose(out, ref_out, atol=1e-5, rtol=1e-5)
    assert jnp.allclose(out2, ref_out2, atol=1e-5, rtol=1e-5)

    print("KERNEL_OK")
</pallas_src>

<mosaic_0001>
module attributes {stable_mosaic.version = 11 : i64} {
  func.func @laugh_classifier_kernel(%arg0: i32, %arg1: memref<8x32xf32, #tpu.memory_space<vmem>>, %arg2: memref<32x128xf32, #tpu.memory_space<vmem>>, %arg3: memref<1x128xf32, #tpu.memory_space<vmem>>, %arg4: memref<128x128xf32, #tpu.memory_space<vmem>>, %arg5: memref<1x128xf32, #tpu.memory_space<vmem>>, %arg6: memref<8x128xf32, #tpu.memory_space<vmem>>) attributes {dimension_semantics = [#tpu.dimension_semantics<parallel>], iteration_bounds = array<i64: 2>, scalar_prefetch = 0 : i64, scratch_operands = 0 : i64, tpu.core_type = #tpu.core_type<tc>, window_params = [{transform_indices = @transform_0, window_bounds = array<i64: 8, 32>}, {pipeline_mode = #tpu.pipeline_mode<synchronous>, transform_indices = @transform_1, window_bounds = array<i64: 32, 128>}, {pipeline_mode = #tpu.pipeline_mode<synchronous>, transform_indices = @transform_2, window_bounds = array<i64: 1, 128>}, {pipeline_mode = #tpu.pipeline_mode<synchronous>, transform_indices = @transform_3, window_bounds = array<i64: 128, 128>}, {pipeline_mode = #tpu.pipeline_mode<synchronous>, transform_indices = @transform_4, window_bounds = array<i64: 1, 128>}, {transform_indices = @transform_5, window_bounds = array<i64: 8, 128>}]} {
    %c0 = arith.constant 0 : index
    %c0_0 = arith.constant 0 : index
    %0 = vector.load %arg1[%c0, %c0_0] : memref<8x32xf32, #tpu.memory_space<vmem>>, vector<8x32xf32>
    %c0_1 = arith.constant 0 : index
    %c0_2 = arith.constant 0 : index
    %1 = vector.load %arg2[%c0_1, %c0_2] : memref<32x128xf32, #tpu.memory_space<vmem>>, vector<32x128xf32>
    %cst = arith.constant dense<0.000000e+00> : vector<8x128xf32>
    %2 = tpu.matmul %0, %1, %cst {dimension_numbers = #tpu.dot_dimension_numbers<[1], [0], [0], [1], [0, 0, 1, 1], [], []>} : vector<8x32xf32>, vector<32x128xf32>, vector<8x128xf32> -> vector<8x128xf32>
    %c0_3 = arith.constant 0 : index
    %c0_4 = arith.constant 0 : index
    %3 = vector.load %arg3[%c0_3, %c0_4] : memref<1x128xf32, #tpu.memory_space<vmem>>, vector<1x128xf32>
    %4 = vector.broadcast %3 : vector<1x128xf32> to vector<8x128xf32>
    %5 = arith.addf %2, %4 : vector<8x128xf32>
    %cst_5 = arith.constant 0.000000e+00 : f32
    %6 = vector.broadcast %cst_5 : f32 to vector<8x128xf32>
    %7 = arith.maximumf %5, %6 : vector<8x128xf32>
    %c0_6 = arith.constant 0 : index
    %c0_7 = arith.constant 0 : index
    %8 = vector.load %arg4[%c0_6, %c0_7] : memref<128x128xf32, #tpu.memory_space<vmem>>, vector<128x128xf32>
    %cst_8 = arith.constant dense<0.000000e+00> : vector<8x128xf32>
    %9 = tpu.matmul %7, %8, %cst_8 {dimension_numbers = #tpu.dot_dimension_numbers<[1], [0], [0], [1], [0, 0, 1, 1], [], []>} : vector<8x128xf32>, vector<128x128xf32>, vector<8x128xf32> -> vector<8x128xf32>
    %c0_9 = arith.constant 0 : index
    %c0_10 = arith.constant 0 : index
    %10 = vector.load %arg5[%c0_9, %c0_10] : memref<1x128xf32, #tpu.memory_space<vmem>>, vector<1x128xf32>
    %11 = vector.broadcast %10 : vector<1x128xf32> to vector<8x128xf32>
    %12 = arith.addf %9, %11 : vector<8x128xf32>
    %13 = arith.negf %12 : vector<8x128xf32>
    %14 = math.exp %13 : vector<8x128xf32>
    %cst_11 = arith.constant 1.000000e+00 : f32
    %15 = vector.broadcast %cst_11 : f32 to vector<8x128xf32>
    %16 = arith.addf %15, %14 : vector<8x128xf32>
    %17 = arith.divf %15, %16 : vector<8x128xf32>
    %18 = tpu.iota {dimensions = array<i32: 1>} : vector<8x128xi32>
    %c64_i32 = arith.constant 64 : i32
    %19 = vector.broadcast %c64_i32 : i32 to vector<8x128xi32>
    %20 = arith.cmpi slt, %18, %19 : vector<8x128xi32>
    %21 = arith.select %20, %7, %17 : vector<8x128xi1>, vector<8x128xf32>
    %c0_12 = arith.constant 0 : index
    %c0_13 = arith.constant 0 : index
    %22 = vector.load %arg6[%c0_12, %c0_13] : memref<8x128xf32, #tpu.memory_space<vmem>>, vector<8x128xf32>
    tpu.vector_store %arg6[%c0_12, %c0_13], %21 {strides = array<i32>} : memref<8x128xf32, #tpu.memory_space<vmem>>, vector<8x128xf32>,
    return
  }
  func.func @transform_0(%arg0: i32) -> (i32, i32) {
    %c0_i32 = arith.constant 0 : i32
    %c0_i32_0 = arith.constant 0 : i32
    return %arg0, %c0_i32 : i32, i32
  }
  func.func @transform_1(%arg0: i32) -> (i32, i32) {
    %c0_i32 = arith.constant 0 : i32
    %c0_i32_0 = arith.constant 0 : i32
    %c0_i32_1 = arith.constant 0 : i32
    return %c0_i32, %c0_i32_0 : i32, i32
  }
  func.func @transform_2(%arg0: i32) -> (i32, i32) {
    %c0_i32 = arith.constant 0 : i32
    %c0_i32_0 = arith.constant 0 : i32
    %c0_i32_1 = arith.constant 0 : i32
    return %c0_i32, %c0_i32_0 : i32, i32
  }
  func.func @transform_3(%arg0: i32) -> (i32, i32) {
    %c0_i32 = arith.constant 0 : i32
    %c0_i32_0 = arith.constant 0 : i32
    %c0_i32_1 = arith.constant 0 : i32
    return %c0_i32, %c0_i32_0 : i32, i32
  }
  func.func @transform_4(%arg0: i32) -> (i32, i32) {
    %c0_i32 = arith.constant 0 : i32
    %c0_i32_0 = arith.constant 0 : i32
    %c0_i32_1 = arith.constant 0 : i32
    return %c0_i32, %c0_i32_0 : i32, i32
  }
  func.func @transform_5(%arg0: i32) -> (i32, i32) {
    %c0_i32 = arith.constant 0 : i32
    %c0_i32_0 = arith.constant 0 : i32
    return %arg0, %c0_i32 : i32, i32
  }
}

</mosaic_0001>

<bundles_post_ra>
// kernel: laugh_classifier.1
= control target key start
LH: loop header
LB: loop body
LE: loop exit
PB: predicated region body
PF: predicated region fallthrough
CT: control target
= control target key end

     0   :  { %10 = vsyncpa [#allocation3], 0  ;;  %s820_s0 = inlined_call_operand.hbm [shape: f32[16,32], index: 0, kind: input, shape index: {}]   ;;  %s821_s1 = inlined_call_operand.hbm [shape: f32[32,128], index: 1, kind: input, shape index: {}]   ;;  %s822_s2 = inlined_call_operand.vmem [shape: f32[1,128], index: 2, kind: input, shape index: {}]   ;;  %s823_s3 = inlined_call_operand.hbm [shape: f32[128,128], index: 3, kind: input, shape index: {}]   ;;  %s824_s4 = inlined_call_operand.vmem [shape: f32[1,128], index: 4, kind: input, shape index: {}]   ;;  %s825_s5 = inlined_call_operand.vmem [shape: f32[16,128], index: 5, kind: output, shape index: {}]  }
   0x1   :  { %12 = vsyncpa [#allocation3 + $0x1], 0 }
   0x2   :  { %13 = vsyncpa [#allocation5], 0  ;;  %s705_s18 = smov 0   ;;  %s707_s19 = smov 0  }
   0x3   :  { %s709_s20 = smov 0   ;;  %s711_s21 = smov 0  }
   0x4 LB: > { %s171_s24 = sshll.u32 %s821_s1, 4  ;;  %s729_s25 = sadd.s32 4294967295, %s669_s21   ;;  %s669_s21 = sphi %s711_s21, %s832_s21   ;;  %s665_s20 = sphi %s709_s20, %s831_s20   ;;  %s661_s19 = sphi %s707_s19, %s830_s19   ;;  %s657_s18 = sphi %s705_s18, %s829_s18   ;;  %s172_s24 = int_to_ptr.hbm [resolvable:$true] %s171_s24 }
   0x5   : > { %p458_p0 = scmp.ge.s32.totalorder %s669_s21, 1  ;;  %p40_p1 = scmp.eq.s32.totalorder %s729_s25, 0 }
   0x6   : > { %p160_p2 = scmp.lt.s32.totalorder %s669_s21, 3  ;;  %s671_s27 = smov [#allocation4]  }
   0x7   : > { %s173_s28 = sshll.u32 %s671_s27, 4  ;;  %s188_s6 = sshll.u32 %s823_s3, 4  ;;  %s174_s28 = int_to_ptr.vmem [resolvable:$true] %s173_s28  ;;  %s189_s6 = int_to_ptr.hbm [resolvable:$true] %s188_s6 }
   0x8   : > { %p734_p3 = pnand %p458_p0, %p160_p2  ;;  %s672_s7 = smov [#allocation6]  }
   0x9   : > { %s190_s8 = sshll.u32 %s672_s7, 4  ;;  %s673_s9 = smov 128   ;;  %s191_s8 = int_to_ptr.vmem [resolvable:$true] %s190_s8 }
   0xa   : > { %p483_p4 = pneg %p734_p3  ;;  %s674_s10 = smov 8  }
   0xb   : > { %s746_s11 = sadd.s32 1, %s669_s21   ;;  %s26_s13 = sadd.s32 1, %s665_s20 }
   0xc   : > { %p484_p5 = pnand %p483_p4, %p40_p1  ;;  %s23_s12 = ssub.s32 %s669_s21, %s746_s11 }
   0xd   : > { %p24_p6 = scmp.eq.s32.totalorder %s23_s12, 0  ;;  %p33_p7 = scmp.ne.s32.totalorder %s665_s20, %s661_s19 }
   0xe   : > { %486 = dma.hbm_to_vmem [thread:$0]  (!%p484_p5), %s172_s24, 512, %s174_s28, [#allocation5], %s673_s9, %s673_s9, %s674_s10  }
   0xf   : > { %489 = dma.hbm_to_vmem [thread:$0]  (!%p484_p5), %s189_s6, 2048, %s191_s8, [#allocation5], %s673_s9, %s673_s9, %s674_s10  }
  0x10   : > { %p34_p8 = scmp.eq.s32.totalorder %s669_s21, 0  ;;  %p39_p9 = scmp.ne.s32.totalorder %s661_s19, %s657_s18 }
  0x11   : > { %s757_s14 = scalar_select %p24_p6, %s665_s20, %s26_s13  }
  0x12   : > { %p761_p10 = por %p40_p1, %p39_p9  ;;  %p496_p11 = scmp.lt.s32.totalorder %s669_s21, 2 }
  0x13   : > { %s207_s16 = sand.u32 1, %s665_s20   ;;  %s463_s17 = sshll.u32 %s669_s21, 3 }
  0x14   : > { %p35_p12 = por %p34_p8, %p33_p7  ;;  %s462_s22 = sshll.u32 %s207_s16, 3 }
  0x15   : > { %s215_s27 = scalar_lea.hbm %s820_s0, %s463_s17  ;;  %s211_s29 = scalar_lea.vmem [#allocation2], %s462_s22 }
  0x16   : > { %s217_s28 = sshll.u32 %s215_s27, 4  ;;  %s219_s30 = sshll.u32 %s211_s29, 4  ;;  %s218_s28 = int_to_ptr.hbm [resolvable:$true] %s217_s28  ;;  %s220_s30 = int_to_ptr.vmem [resolvable:$true] %s219_s30 }
  0x17   : > { %p771_p13 = pnand %p496_p11, %p35_p12  ;;  %s208_s6 = scalar_lea.sflag [#allocation3], %s207_s16 }
  0x18   : > { %s601_s7 = sshra.s32 %s218_s28, 4  ;;  %s608_s10 = scalar_lea.hbm %s820_s0, 16  ;;  %s602_s7 = int_to_ptr.hbm [resolvable:$true] %s601_s7 }
  0x19   : > { %s603_s21 = scalar_lea.hbm %s602_s7, 8  ;;  %p605_p2 = pneg %p771_p13 }
  0x1a   : > { %p604_p0 = scmp.ne.s32.totalorder %s602_s7, %s603_s21  ;;  %p609_p6 = scmp.lt.s32.totalorder %s602_s7, %s820_s0 }
  0x1b   : > { %p610_p7 = scmp.lt.s32.totalorder %s608_s10, %s603_s21 }
  0x1c   : > { %p606_p4 = pnand %p605_p2, %p604_p0 }
  0x1d   : > { %p611_p8 = por %p610_p7, %p609_p6 }
  0x1e   : > { %p607_p5 = pneg %p606_p4 }
  0x20   : > { %p612_p9 = pnand %p611_p8, %p607_p5 }
  0x22   : > { %615 = shalt.err (!%p612_p9)
}
  0x23   : > { %493 = dma.hbm_to_vmem [thread:$0]  (!%p771_p13), %s218_s28, 128, %s220_s30, %s208_s6  }
  0x24   : > { %228 = sbr.rel (%p734_p3) target bundleno = 340 (0x154), region = 40  ;;  %s230_s16 = sand.u32 (!%p734_p3), 1, %s661_s19  }
  0x25   : > { %s465_s17 = sshll.u32 (!%p734_p3), %s230_s16, 3  ;;  %s231_s22 = scalar_lea.sflag (!%p734_p3), [#allocation3], %s230_s16 }
  0x26   : > { %s234_s23 = scalar_lea.vmem (!%p734_p3), [#allocation2], %s465_s17 }
  0x29   : > { %648 = dma.done.wait (%p761_p10), %s231_s22, 128  }
  0x2a   : > { %650 = vsyncadd (%p761_p10), %s231_s22, 4294967168 }
  0x2b   : > { %652 = dma.done.wait (%p40_p1), [#allocation5], 2560  }
  0x2c   : > { %654 = vsyncadd (%p40_p1), [#allocation5], 4294964736  ;;  %v279_v0 = vld [vmem:[#allocation4 + $0x18] sm:$0xff]  ;;  %v278_v1 = vld [vmem:[#allocation4 + $0x10] sm:$0xff]  ;;  %vm284_vm0 = vcmask 261120   ;;  %p271_p1 = scmp.lt.s32.totalorder %s729_s25, 1  ;;  %v368_v32 = vlaneseq }
  0x2d   : > { %300 = vmatpush.msra.mxu0 %v279_v0  ;;  %v324_v2 = vld [vmem:[#allocation6 + $0x78] sm:$0xff]  ;;  %v277_v3 = vld [vmem:[#allocation4 + $0x8] sm:$0xff]  ;;  %v323_v4 = vld [vmem:[#allocation6 + $0x70] sm:$0xff] }
  0x2e   : > { %329 = vmatpush.msra.mxu1 %v324_v2  ;;  %v322_v5 = vld [vmem:[#allocation6 + $0x68] sm:$0xff]  ;;  %v276_v6 = vld [vmem:[#allocation4] sm:$0xff]  ;;  %v275_v7 = vld [vmem:[%s234_s23] sm:$0xff]  ;;  %s834_s25 = smov (!%p271_p1, %s729_s25), 1  ;;  %v369_v36 = vand.u32 127, %v368_v32 }
  0x2f   : > { %301 = vmatpush.msra.mxu0 %v278_v1  ;;  %v321_v8 = vld [vmem:[#allocation6 + $0x60] sm:$0xff]  ;;  %v320_v9 = vld [vmem:[#allocation6 + $0x58] sm:$0xff]  ;;  %v319_v10 = vld [vmem:[#allocation6 + $0x50] sm:$0xff]  ;;  %s468_s28 = sshll.u32 %s834_s25, 3 }
  0x30   : > { %330 = vmatpush.msra.mxu1 %v323_v4  ;;  %v318_v11 = vld [vmem:[#allocation6 + $0x48] sm:$0xff]  ;;  %v317_v12 = vld [vmem:[#allocation6 + $0x40] sm:$0xff]  ;;  %v316_v13 = vld [vmem:[#allocation6 + $0x38] sm:$0xff]  ;;  %vm370_vm4 = vcmp.lt.s32.totalorder %v369_v36, 64  ;;  %s274_s18 = scalar_lea.vmem %s825_s5, %s468_s28 }
  0x31   : > { %302 = vmatpush.msra.mxu0 %v277_v3  ;;  %v315_v14 = vld [vmem:[#allocation6 + $0x30] sm:$0xff]  ;;  %v314_v15 = vld [vmem:[#allocation6 + $0x28] sm:$0xff]  ;;  %v313_v16 = vld [vmem:[#allocation6 + $0x20] sm:$0xff] }
  0x32   : > { %331 = vmatpush.msra.mxu1 %v322_v5  ;;  %v312_v17 = vld [vmem:[#allocation6 + $0x18] sm:$0xff]  ;;  %v311_v18 = vld [vmem:[#allocation6 + $0x10] sm:$0xff]  ;;  %v310_v19 = vld [vmem:[#allocation6 + $0x8] sm:$0xff] }
  0x33   : > { %303 = vmatpush.msra.mxu0 %v276_v6  ;;  %v309_v20 = vld [vmem:[#allocation6] sm:$0xff]  ;;  %v535_v21 = vld [vmem:[%s822_s2] ss:$0 sm:$0xff] }
  0x34   : > { %469 = vmatmul.msk.f32.vlgmr.msra.gmra.mxu0 %vm284_vm0, %v275_v7  ;;  %332 = vmatpush.msra.mxu1 %v321_v8  ;;  %v536_v25 = vld [vmem:[%s824_s4] ss:$0 sm:$0xff] }
  0x36   : > { %333 = vmatpush.msra.mxu1 %v320_v9 }
  0x38   : > { %334 = vmatpush.msra.mxu1 %v319_v10 }
  0x3a   : > { %335 = vmatpush.msra.mxu1 %v318_v11 }
  0x3c   : > { %336 = vmatpush.msra.mxu1 %v317_v12 }
  0x3e   : > { %337 = vmatpush.msra.mxu1 %v316_v13 }
  0x40   : > { %338 = vmatpush.msra.mxu1 %v315_v14 }
  0x42   : > { %339 = vmatpush.msra.mxu1 %v314_v15 }
  0x44   : > { %340 = vmatpush.msra.mxu1 %v313_v16 }
  0x46   : > { %341 = vmatpush.msra.mxu1 %v312_v17 }
  0x48   : > { %342 = vmatpush.msra.mxu1 %v311_v18 }
  0x4a   : > { %343 = vmatpush.msra.mxu1 %v310_v19 }
  0x4c   : > { %344 = vmatpush.msra.mxu1 %v309_v20 }
  0xb1   : > { %v305_v22 = vpop.f32.mrf.mxu0 }
  0xb2   : > { %v306_v23 = vadd.f32 %v535_v21, %v305_v22 }
  0xb4   : > { %v308_v24 = vmax.f32 %v306_v23, 0.0 }
  0xb6   : > { %345 = vmatmul.f32.vlgmr.msra.gmra.mxu1 %v308_v24 }
 0x133   : > { %v346_v26 = vpop.f32.mrf.mxu1 }
 0x134   : > { %v347_v27 = vadd.f32 %v536_v25, %v346_v26 }
 0x136   : > { %v470_v28 = vmul.f32 -1.442695, %v347_v27 }
 0x138   : > { %537 = vpow2.f32 %v470_v28 }
 0x13e   : > { %v538_v29 = vpop.eup %537 }
 0x13f   : > { %v352_v30 = vadd.f32 1.0, %v538_v29 }
 0x141   : > { %539 = vrcp.f32 %v352_v30  ;;  %v364_v35 = vand.u32 2147483648, %v352_v30  ;;  %v362_v38 = vand.u32 2147483647, %v352_v30  ;;  %vm358_vm2 = vweird.f32 %v352_v30 }
 0x143   : > { %v365_v40 = vor.u32 1.1754944e-38, %v364_v35  ;;  %vm363_vm5 = vcmp.eq.f32.partialorder %v362_v38, 8.507059e+37 }
 0x147   : > { %v540_v31 = vpop.eup %539 }
 0x148   : > { %v354_v33 = vmul.f32 %v540_v31, %v352_v30  ;;  %vm359_vm1 = vweird.f32 %v540_v31 }
 0x149   : > { %vm360_vm3 = vmor %vm358_vm2, %vm359_vm1 }
 0x14a   : > { %v355_v34 = vsub.f32 1.0, %v354_v33 }
 0x14c   : > { %v356_v37 = vmul.f32 %v540_v31, %v355_v34 }
 0x14e   : > { %v357_v39 = vadd.f32 %v540_v31, %v356_v37 }
 0x150   : > { %v361_v41 = vsel %vm360_vm3, %v540_v31, %v357_v39 }
 0x151   : > { %v366_v42 = vsel %vm363_vm5, %v365_v40, %v361_v41 }
 0x152   : > { %v371_v43 = vsel %vm370_vm4, %v308_v24, %v366_v42 }
 0x153   : > { %372 = vst [vmem:[%s274_s18] sm:$0xff] %v371_v43 }
 0x154 PF: > { %p16_p3 = scmp.ge.s32.totalorder %s746_s11, 4   ;;  %s829_s18 = smov %s661_s19 }
 0x155   : > { %s830_s19 = smov %s665_s20  ;;  %s831_s20 = smov %s757_s14 }
 0x156   : > { %s832_s21 = smov %s746_s11  ;;  %18 = sbr.rel (!%p16_p3) target bundleno = 4 (0x4), region = 88 }
 0x15b   :  { %392 = vsyncpa [#allocation3], 1 }
 0x15c   :  { %394 = vsyncpa [#allocation3 + $0x1], 1 }
 0x15d   :  { %395 = vsyncpa [#allocation5], 1 }

</bundles_post_ra>
